<compile_context>
chip_gen: v7x
topology: tpu7x:2x2x1
jax: 0.10.0
libtpu: 0.0.40
codegen_flags: <defaults>
</compile_context>

<pallas_src>
import math
import functools

import jax
import jax.numpy as jnp
from jax.experimental import pallas as pl
from jax.experimental.pallas import tpu as pltpu

NEG_BIG = 1e30  # finite stand-in for -inf (fully-masked rows -> uniform, not NaN)


# --------------------------------- kernel ---------------------------------

def _basic_attention_kernel(scale, residual, has_values, has_mask, compute_dtype,
                            *refs):
    refs = list(refs)
    xs_ref = refs.pop(0)                       # (1, x_len, dim)
    ys_ref = refs.pop(0)                       # (1, y_len, dim)
    vals_ref = refs.pop(0) if has_values else ys_ref
    mask_ref = refs.pop(0) if has_mask else None   # (1, 1, y_len)
    emb_ref, w_ref = refs                      # (1, x_len, dim), (1, x_len, y_len)

    xs = xs_ref[0]                             # (x_len, dim)
    ys = ys_ref[0]                             # (y_len, dim)

    # scores = xs @ ys^T  -- contract the feature axis directly (no transpose).
    s = jax.lax.dot_general(
        xs.astype(compute_dtype), ys.astype(compute_dtype),
        dimension_numbers=(((1,), (1,)), ((), ())),
        preferred_element_type=jnp.float32)    # (x_len, y_len), f32
    if scale != 1.0:
        s = s * scale

    if has_mask:
        # additive mask bias: 0 where attend, -1e30 where masked; broadcast over rows.
        s = s + (mask_ref[0] - 1.0) * NEG_BIG

    # softmax over keys (stable), reciprocal on the EUP.
    m = jnp.max(s, axis=-1, keepdims=True)
    e = jnp.exp(s - m)
    p = e * pl.reciprocal(jnp.sum(e, axis=-1, keepdims=True), approx=True)

    vals = vals_ref[0]                         # (y_len, dim)
    out = jnp.dot(p.astype(compute_dtype), vals.astype(compute_dtype),
                  preferred_element_type=jnp.float32)   # (x_len, dim)
    if residual:
        out = out + xs

    emb_ref[0] = out.astype(emb_ref.dtype)
    w_ref[0] = p.astype(w_ref.dtype)


# --------------------------------- wrapper ---------------------------------

def basic_attention(xs, ys, mask_ys=None, values=None, *, attn='sqrt',
                    residual=False, get_weights=True,
                    compute_dtype=jnp.float32):
    """Pallas TPU implementation of BasicAttention.forward (bmm attention path).

    xs: f32[B, x_len, dim]   queries
    ys: f32[B, y_len, dim]   keys
    mask_ys: [B, y_len] (any dtype; nonzero == attend) or None
    values:  f32[B, y_len, dim] or None (defaults to ys)
    """
    if attn == 'cosine':
        # TODO(synk): cosine-similarity scoring path (nn.CosineSimilarity over dim=1)
        # has no clean batched-attention shape; not implemented as a Pallas kernel.
        raise NotImplementedError("attn='cosine' path not implemented")

    B, x_len, dim = xs.shape
    y_len = ys.shape[1]
    scale = (1.0 / math.sqrt(dim)) if attn == 'sqrt' else 1.0
    has_values = values is not None
    has_mask = mask_ys is not None

    args = [xs, ys]
    in_specs = [
        pl.BlockSpec((1, x_len, dim), lambda b: (b, 0, 0)),   # xs
        pl.BlockSpec((1, y_len, dim), lambda b: (b, 0, 0)),   # ys (reused as V if values is None)
    ]
    if has_values:
        args.append(values)
        in_specs.append(pl.BlockSpec((1, y_len, dim), lambda b: (b, 0, 0)))
    if has_mask:
        mask_f = (mask_ys != 0).astype(jnp.float32).reshape(B, 1, y_len)
        args.append(mask_f)
        in_specs.append(pl.BlockSpec((1, 1, y_len), lambda b: (b, 0, 0)))

    out_shape = (jax.ShapeDtypeStruct((B, x_len, dim), xs.dtype),
                 jax.ShapeDtypeStruct((B, x_len, y_len), jnp.float32))
    out_specs = (pl.BlockSpec((1, x_len, dim), lambda b: (b, 0, 0)),
                 pl.BlockSpec((1, x_len, y_len), lambda b: (b, 0, 0)))

    kernel = functools.partial(_basic_attention_kernel, scale, residual,
                               has_values, has_mask, compute_dtype)

    lhs_emb, weights = pl.pallas_call(
        kernel,
        grid=(B,),
        in_specs=in_specs,
        out_specs=out_specs,
        out_shape=out_shape,
        compiler_params=pltpu.CompilerParams(
            dimension_semantics=("parallel",)),   # v7x: one batch element per TC
    )(*args)

    # torch .squeeze(self.dim - 1) with dim=2 -> squeeze(1): only acts if x_len == 1
    if x_len == 1:
        lhs_emb = jnp.squeeze(lhs_emb, axis=1)

    if get_weights:
        return lhs_emb, weights
    return lhs_emb


# --------------------------- pure-JAX reference ---------------------------

def _reference(xs, ys, mask_ys=None, values=None, attn='sqrt', residual=False):
    dim = ys.shape[-1]
    s = jnp.einsum('bqd,bkd->bqk', xs, ys)
    if attn == 'sqrt':
        s = s / math.sqrt(dim)
    if mask_ys is not None:
        bias = ((mask_ys != 0).astype(jnp.float32) - 1.0) * NEG_BIG
        s = s + bias[:, None, :]
    p = jax.nn.softmax(s, axis=-1)
    v = ys if values is None else values
    out = jnp.einsum('bqk,bkd->bqd', p, v)
    if residual:
        out = out + xs
    return out, p


# ------------------------------------ main ------------------------------------

if __name__ == "__main__":
    B, x_len, y_len, dim = 2, 8, 8, 128   # dim=128 keeps loads/stores lane-dense

    key = jax.random.PRNGKey(0)
    k_x, k_y = jax.random.split(key, 2)
    xs = jax.random.normal(k_x, (B, x_len, dim), jnp.float32)
    ys = jax.random.normal(k_y, (B, y_len, dim), jnp.float32)
    mask_ys = jnp.ones((B, y_len), jnp.float32).at[1, -2:].set(0.0)  # pad last 2 keys of batch 1

    emb, w = basic_attention(xs, ys, mask_ys=mask_ys, values=None,
                             attn='sqrt', residual=False, get_weights=True)
    jax.block_until_ready(emb)
    jax.block_until_ready(w)

    assert emb.shape == (B, x_len, dim)
    assert w.shape == (B, x_len, y_len)

    ref_emb, ref_w = _reference(xs, ys, mask_ys=mask_ys)
    err_e = float(jnp.max(jnp.abs(emb - ref_emb)))
    err_w = float(jnp.max(jnp.abs(w - ref_w)))
    assert err_e < 1e-2 and err_w < 1e-2, (err_e, err_w)

    print("KERNEL_OK")
</pallas_src>

<mosaic_0001>
module attributes {stable_mosaic.version = 11 : i64} {
  func.func @_basic_attention_kernel(%arg0: i32, %arg1: memref<1x8x128xf32, #tpu.memory_space<vmem>>, %arg2: memref<1x8x128xf32, #tpu.memory_space<vmem>>, %arg3: memref<1x1x8xf32, #tpu.memory_space<vmem>>, %arg4: memref<1x8x128xf32, #tpu.memory_space<vmem>>, %arg5: memref<1x8x8xf32, #tpu.memory_space<vmem>>) attributes {dimension_semantics = [#tpu.dimension_semantics<parallel>], iteration_bounds = array<i64: 2>, scalar_prefetch = 0 : i64, scratch_operands = 0 : i64, tpu.core_type = #tpu.core_type<tc>, window_params = [{transform_indices = @transform_0, window_bounds = array<i64: 1, 8, 128>}, {transform_indices = @transform_1, window_bounds = array<i64: 1, 8, 128>}, {transform_indices = @transform_2, window_bounds = array<i64: 1, 1, 8>}, {transform_indices = @transform_3, window_bounds = array<i64: 1, 8, 128>}, {transform_indices = @transform_4, window_bounds = array<i64: 1, 8, 8>}]} {
    %c0 = arith.constant 0 : index
    %c0_0 = arith.constant 0 : index
    %c0_1 = arith.constant 0 : index
    %0 = vector.load %arg1[%c0, %c0_0, %c0_1] : memref<1x8x128xf32, #tpu.memory_space<vmem>>, vector<1x8x128xf32>
    %1 = vector.shape_cast %0 : vector<1x8x128xf32> to vector<8x128xf32>
    %c0_2 = arith.constant 0 : index
    %c0_3 = arith.constant 0 : index
    %c0_4 = arith.constant 0 : index
    %2 = vector.load %arg2[%c0_2, %c0_3, %c0_4] : memref<1x8x128xf32, #tpu.memory_space<vmem>>, vector<1x8x128xf32>
    %3 = vector.shape_cast %2 : vector<1x8x128xf32> to vector<8x128xf32>
    %cst = arith.constant dense<0.000000e+00> : vector<8x8xf32>
    %4 = tpu.matmul %1, %3, %cst {dimension_numbers = #tpu.dot_dimension_numbers<[1], [1], [0], [0], [0, 0, 1, 0], [], []>} : vector<8x128xf32>, vector<8x128xf32>, vector<8x8xf32> -> vector<8x8xf32>
    %cst_5 = arith.constant 0.0883883461 : f32
    %5 = vector.broadcast %cst_5 : f32 to vector<8x8xf32>
    %6 = arith.mulf %4, %5 : vector<8x8xf32>
    %c0_6 = arith.constant 0 : index
    %c0_7 = arith.constant 0 : index
    %c0_8 = arith.constant 0 : index
    %7 = vector.load %arg3[%c0_6, %c0_7, %c0_8] : memref<1x1x8xf32, #tpu.memory_space<vmem>>, vector<1x1x8xf32>
    %8 = vector.shape_cast %7 : vector<1x1x8xf32> to vector<1x8xf32>
    %cst_9 = arith.constant 1.000000e+00 : f32
    %9 = vector.broadcast %cst_9 : f32 to vector<1x8xf32>
    %10 = arith.subf %8, %9 : vector<1x8xf32>
    %cst_10 = arith.constant 1.000000e+30 : f32
    %11 = vector.broadcast %cst_10 : f32 to vector<1x8xf32>
    %12 = arith.mulf %10, %11 : vector<1x8xf32>
    %13 = vector.broadcast %12 : vector<1x8xf32> to vector<8x8xf32>
    %14 = arith.addf %6, %13 : vector<8x8xf32>
    %cst_11 = arith.constant dense<0xFF800000> : vector<8xf32>
    %15 = vector.multi_reduction <maximumf>, %14, %cst_11 [1] : vector<8x8xf32> to vector<8xf32>
    %16 = vector.shape_cast %15 : vector<8xf32> to vector<8x1xf32>
    %17 = vector.broadcast %16 : vector<8x1xf32> to vector<8x8xf32>
    %18 = arith.subf %14, %17 : vector<8x8xf32>
    %19 = math.exp %18 : vector<8x8xf32>
    %cst_12 = arith.constant dense<0.000000e+00> : vector<8xf32>
    %20 = vector.multi_reduction <add>, %19, %cst_12 [1] : vector<8x8xf32> to vector<8xf32>
    %21 = vector.shape_cast %20 : vector<8xf32> to vector<8x1xf32>
    %22 = tpu.reciprocal %21 {approx = true} : vector<8x1xf32> -> vector<8x1xf32>
    %23 = vector.broadcast %22 : vector<8x1xf32> to vector<8x8xf32>
    %24 = arith.mulf %19, %23 : vector<8x8xf32>
    %c0_13 = arith.constant 0 : index
    %c0_14 = arith.constant 0 : index
    %c0_15 = arith.constant 0 : index
    %25 = vector.load %arg2[%c0_13, %c0_14, %c0_15] : memref<1x8x128xf32, #tpu.memory_space<vmem>>, vector<1x8x128xf32>
    %26 = vector.shape_cast %25 : vector<1x8x128xf32> to vector<8x128xf32>
    %cst_16 = arith.constant dense<0.000000e+00> : vector<8x128xf32>
    %27 = tpu.matmul %24, %26, %cst_16 {dimension_numbers = #tpu.dot_dimension_numbers<[1], [0], [0], [1], [0, 0, 1, 1], [], []>} : vector<8x8xf32>, vector<8x128xf32>, vector<8x128xf32> -> vector<8x128xf32>
    %c0_17 = arith.constant 0 : index
    %c0_18 = arith.constant 0 : index
    %c0_19 = arith.constant 0 : index
    %28 = vector.load %arg4[%c0_17, %c0_18, %c0_19] : memref<1x8x128xf32, #tpu.memory_space<vmem>>, vector<1x8x128xf32>
    %29 = vector.shape_cast %28 : vector<1x8x128xf32> to vector<8x128xf32>
    %30 = vector.shape_cast %27 : vector<8x128xf32> to vector<1x8x128xf32>
    tpu.vector_store %arg4[%c0_17, %c0_18, %c0_19], %30 {strides = array<i32>} : memref<1x8x128xf32, #tpu.memory_space<vmem>>, vector<1x8x128xf32>,
    %c0_20 = arith.constant 0 : index
    %c0_21 = arith.constant 0 : index
    %c0_22 = arith.constant 0 : index
    %31 = vector.load %arg5[%c0_20, %c0_21, %c0_22] : memref<1x8x8xf32, #tpu.memory_space<vmem>>, vector<1x8x8xf32>
    %32 = vector.shape_cast %31 : vector<1x8x8xf32> to vector<8x8xf32>
    %33 = vector.shape_cast %24 : vector<8x8xf32> to vector<1x8x8xf32>
    tpu.vector_store %arg5[%c0_20, %c0_21, %c0_22], %33 {strides = array<i32>} : memref<1x8x8xf32, #tpu.memory_space<vmem>>, vector<1x8x8xf32>,
    return
  }
  func.func @transform_0(%arg0: i32) -> (i32, i32, i32) {
    %c0_i32 = arith.constant 0 : i32
    %c0_i32_0 = arith.constant 0 : i32
    %c0_i32_1 = arith.constant 0 : i32
    return %arg0, %c0_i32, %c0_i32_0 : i32, i32, i32
  }
  func.func @transform_1(%arg0: i32) -> (i32, i32, i32) {
    %c0_i32 = arith.constant 0 : i32
    %c0_i32_0 = arith.constant 0 : i32
    %c0_i32_1 = arith.constant 0 : i32
    return %arg0, %c0_i32, %c0_i32_0 : i32, i32, i32
  }
  func.func @transform_2(%arg0: i32) -> (i32, i32, i32) {
    %c0_i32 = arith.constant 0 : i32
    %c0_i32_0 = arith.constant 0 : i32
    %c0_i32_1 = arith.constant 0 : i32
    return %arg0, %c0_i32, %c0_i32_0 : i32, i32, i32
  }
  func.func @transform_3(%arg0: i32) -> (i32, i32, i32) {
    %c0_i32 = arith.constant 0 : i32
    %c0_i32_0 = arith.constant 0 : i32
    %c0_i32_1 = arith.constant 0 : i32
    return %arg0, %c0_i32, %c0_i32_0 : i32, i32, i32
  }
  func.func @transform_4(%arg0: i32) -> (i32, i32, i32) {
    %c0_i32 = arith.constant 0 : i32
    %c0_i32_0 = arith.constant 0 : i32
    %c0_i32_1 = arith.constant 0 : i32
    return %arg0, %c0_i32, %c0_i32_0 : i32, i32, i32
  }
}

</mosaic_0001>

<bundles_post_ra>
// kernel: tpu_custom_call.1
= control target key start
LH: loop header
LB: loop body
LE: loop exit
PB: predicated region body
PF: predicated region fallthrough
CT: control target
= control target key end

     0   :  { %10 = vsyncpa [#allocation3], 0  ;;  %s1153_s0 = inlined_call_operand.hbm [shape: f32[2,8,128], index: 0, kind: input, shape index: {}]   ;;  %s1154_s1 = inlined_call_operand.hbm [shape: f32[2,8,128], index: 1, kind: input, shape index: {}]   ;;  %s1155_s2 = inlined_call_operand.vmem [shape: f32[2,1,8], index: 2, kind: input, shape index: {}]   ;;  %s1156_s3 = inlined_call_operand.hbm [shape: f32[2,8,128], index: 3, kind: output, shape index: {0}]   ;;  %s1157_s4 = inlined_call_operand.hbm [shape: f32[2,8,8], index: 4, kind: output, shape index: {1}]  }
   0x1   :  { %12 = vsyncpa [#allocation3 + $0x1], 0 }
   0x2   :  { %13 = vsyncpa [#allocation6], 0 }
   0x3   :  { %15 = vsyncpa [#allocation6 + $0x1], 0 }
   0x4   :  { %16 = vsyncpa [#allocation4], 0 }
   0x5   :  { %18 = vsyncpa [#allocation4 + $0x1], 0 }
   0x6   :  { %19 = vsyncpa [#allocation9], 0 }
   0x7   :  { %21 = vsyncpa [#allocation9 + $0x1], 0  ;;  %s902_s15 = smov 0   ;;  %s904_s16 = smov 0  }
   0x8   :  { %s906_s17 = smov 0   ;;  %s908_s18 = smov 0  }
   0x9 LB: > { %s923_s19 = sadd.s32 4294967295, %s869_s18   ;;  %s611_s20 = sadd.s32 4294967294, %s869_s18   ;;  %s869_s18 = sphi %s908_s18, %s1176_s18   ;;  %s865_s17 = sphi %s906_s17, %s1175_s17   ;;  %s861_s16 = sphi %s904_s16, %s1174_s16   ;;  %s857_s15 = sphi %s902_s15, %s1173_s15  }
   0xa   : > { %s927_s21 = sadd.s32 1, %s869_s18   ;;  %s34_s22 = sadd.s32 1, %s865_s17 }
   0xb   : > { %s31_s23 = ssub.s32 %s869_s18, %s927_s21  ;;  %p41_p0 = scmp.ne.s32.totalorder %s865_s17, %s861_s16 }
   0xc   : > { %p32_p1 = scmp.eq.s32.totalorder %s31_s23, 0  ;;  %p42_p2 = scmp.eq.s32.totalorder %s869_s18, 0 }
   0xd   : > { %p47_p3 = scmp.ne.s32.totalorder %s861_s16, %s857_s15  ;;  %p48_p4 = scmp.eq.s32.totalorder %s923_s19, 0 }
   0xe   : > { %s939_s24 = scalar_select %p32_p1, %s865_s17, %s34_s22  }
   0xf   : > { %p941_p5 = por %p42_p2, %p41_p0  ;;  %p945_p6 = por %p48_p4, %p47_p3 }
  0x10   : > { %p123_p7 = scmp.eq.s32.totalorder %s923_s19, 1  ;;  %p129_p8 = scmp.eq.s32.totalorder %s611_s20, 1 }
  0x11   : > { %s1161_s26 = scalar_select %p945_p6, 1, 0 }
  0x12   : > { %p667_p10 = scmp.lt.s32.totalorder %s869_s18, 2  ;;  %p952_p11 = por %p123_p7, %p41_p0 }
  0x13   : > { %p956_p12 = por %p129_p8, %p47_p3  ;;  %s961_s29 = sand.u32 1, %s865_s17  }
  0x14   : > { %s1162_s27 = scalar_select %p952_p11, 1, 0 }
  0x15   : > { %s1163_s28 = scalar_select %p956_p12, 1, 0 }
  0x16   : > { %s615_s30 = sshll.u32 %s869_s18, 7  ;;  %s614_s5 = sshll.u32 %s961_s29, 3 }
  0x17   : > { %s970_s8 = scalar_lea.hbm %s1153_s0, %s615_s30  ;;  %s179_s9 = scalar_lea.vmem [#allocation2], %s614_s5 }
  0x18   : > { %s186_s10 = sshll.u32 %s179_s9, 4  ;;  %p976_p13 = pnand %p667_p10, %p941_p5  ;;  %s980_s10 = int_to_ptr.vmem [resolvable:$true] %s186_s10 }
  0x19   : > { %s176_s12 = scalar_lea.sflag [#allocation3], %s961_s29  ;;  %s707_s13 = scalar_lea.hbm %s970_s8, 128 }
  0x1a   : > { %p708_p2 = scmp.ne.s32.totalorder %s970_s8, %s707_s13  ;;  %p709_p3 = pneg %p976_p13 }
  0x1b   : > { %s712_s22 = scalar_lea.hbm %s1153_s0, 256  ;;  %p713_p5 = scmp.lt.u32.totalorder %s970_s8, %s1153_s0 }
  0x1c   : > { %p710_p4 = pnand %p709_p3, %p708_p2  ;;  %p714_p8 = scmp.lt.u32.totalorder %s712_s22, %s707_s13 }
  0x1d   : > { %p716_p9 = scmp.lt.u32.totalorder %s707_s13, %s970_s8 }
  0x1e   : > { %p711_p7 = pneg %p710_p4  ;;  %p715_p10 = por %p714_p8, %p713_p5 }
  0x20   : > { %p717_p0 = por %p716_p9, %p715_p10 }
  0x22   : > { %p718_p1 = pnand %p717_p0, %p711_p7 }
  0x24   : > { %721 = shalt.err (!%p718_p1)
}
  0x25   : > { %s722_s6 = scalar_lea.vmem %s980_s10, 128  ;;  %s871_s7 = smov [#allocation2]  }
  0x26   : > { %p723_p2 = scmp.ne.s32.totalorder %s980_s10, %s722_s6  ;;  %s727_s9 = sshll.u32 %s871_s7, 4  ;;  %s728_s9 = int_to_ptr.vmem [resolvable:$false] %s727_s9 }
  0x27   : > { %s729_s14 = scalar_lea.vmem %s728_s9, 256  ;;  %p730_p11 = scmp.lt.s32.totalorder %s980_s10, %s728_s9 }
  0x28   : > { %p725_p4 = pnand %p723_p2, %p709_p3  ;;  %p731_p5 = scmp.lt.s32.totalorder %s729_s14, %s722_s6 }
  0x2a   : > { %p726_p12 = pneg %p725_p4  ;;  %p732_p8 = por %p731_p5, %p730_p11 }
  0x2c   : > { %p733_p9 = pnand %p732_p8, %p726_p12 }
  0x2e   : > { %736 = shalt.err (!%p733_p9)
}
  0x2f   : > { %656 = dma.hbm_to_vmem [thread:$0]  (!%p976_p13), %s970_s8, 128, %s980_s10, %s176_s12  }
  0x30   : > { %p1165_p0 = scmp.lt.s32.totalorder %s869_s18, 3  ;;  %p1166_p1 = scmp.ge.s32.totalorder %s869_s18, 1 }
  0x31   : > { %s1023_s23 = scalar_lea.hbm %s1154_s1, %s615_s30  ;;  %s197_s25 = scalar_lea.vmem [#allocation5], %s614_s5 }
  0x32   : > { %p1014_p7 = pnand %p1166_p1, %p1165_p0  ;;  %s204_s6 = sshll.u32 %s197_s25, 4  ;;  %s205_s6 = int_to_ptr.vmem [resolvable:$true] %s204_s6 }
  0x33   : > { %s194_s8 = scalar_lea.sflag [#allocation6], %s961_s29  ;;  %s737_s10 = scalar_lea.hbm %s1023_s23, 128 }
  0x34   : > { %s1167_s13 = scalar_select %p1014_p7, 1, 0 }
  0x35   : > { %p738_p11 = scmp.ne.s32.totalorder %s1023_s23, %s737_s10  ;;  %s742_s30 = scalar_lea.hbm %s1154_s1, 256 }
  0x36   : > { %p743_p2 = scmp.lt.u32.totalorder %s1023_s23, %s1154_s1  ;;  %p744_p4 = scmp.lt.u32.totalorder %s742_s30, %s737_s10 }
  0x37   : > { %p740_p12 = pnand %p738_p11, %p709_p3  ;;  %p746_p8 = scmp.lt.u32.totalorder %s737_s10, %s1023_s23 }
  0x38   : > { %p745_p5 = por %p744_p4, %p743_p2 }
  0x39   : > { %p741_p10 = pneg %p740_p12 }
  0x3a   : > { %p747_p9 = por %p746_p8, %p745_p5 }
  0x3c   : > { %p748_p0 = pnand %p747_p9, %p741_p10 }
  0x3e   : > { %751 = shalt.err (!%p748_p0)
}
  0x3f   : > { %s752_s29 = scalar_lea.vmem %s205_s6, 128  ;;  %s872_s5 = smov [#allocation5]  }
  0x40   : > { %p753_p1 = scmp.ne.s32.totalorder %s205_s6, %s752_s29  ;;  %s757_s20 = sshll.u32 %s872_s5, 4  ;;  %s758_s20 = int_to_ptr.vmem [resolvable:$false] %s757_s20 }
  0x41   : > { %s759_s22 = scalar_lea.vmem %s758_s20, 256  ;;  %p760_p6 = scmp.lt.s32.totalorder %s205_s6, %s758_s20 }
  0x42   : > { %p755_p11 = pnand %p753_p1, %p709_p3  ;;  %p761_p7 = scmp.lt.s32.totalorder %s759_s22, %s752_s29 }
  0x44   : > { %p756_p12 = pneg %p755_p11  ;;  %p762_p2 = por %p761_p7, %p760_p6 }
  0x46   : > { %p763_p4 = pnand %p762_p2, %p756_p12 }
  0x48   : > { %766 = shalt.err (!%p763_p4)
}
  0x49   : > { %659 = dma.hbm_to_vmem [thread:$0]  (!%p976_p13), %s1023_s23, 128, %s205_s6, %s194_s8  }
  0x4a   : > { %p1168_p10 = scmp.ne.s32.totalorder %s1167_s13, 0 }
  0x4b   : > { %s1050_s25 = sand.u32 (!%p1168_p10), 1, %s861_s16   ;;  %p1169_p6 = scmp.ne.s32.totalorder (!%p1168_p10), %s1161_s26, 0 }
  0x4c   : > { %219 = sbr.rel (%p1168_p10) target bundleno = 848 (0x350), region = 32  ;;  %s1053_s10 = sshll.u32 (!%p1168_p10), %s1050_s25, 3 }
  0x4d   : > { %s222_s12 = scalar_lea.sflag (!%p1168_p10), [#allocation3], %s1050_s25  ;;  %s225_s7 = scalar_lea.vmem (!%p1168_p10), [#allocation2], %s1053_s10 }
  0x53   : > { %840 = dma.done.wait (%p1169_p6), %s222_s12, 128  }
  0x54   : > { %842 = vsyncadd (%p1169_p6), %s222_s12, 4294967168  ;;  %s231_s11 = scalar_lea.sflag [#allocation6], %s1050_s25  ;;  %s234_s13 = scalar_lea.vmem [#allocation5], %s1053_s10 }
  0x55   : > { %844 = dma.done.wait (%p1169_p6), %s231_s11, 128  }
  0x56   : > { %846 = vsyncadd (%p1169_p6), %s231_s11, 4294967168  ;;  %v873_v0 = vmov 0.0   ;;  %vm874_vm0 = vmmov 0   ;;  %v276_v1 = vld [vmem:[%s234_s13] sm:$0xff]  ;;  %v275_v2 = vld [vmem:[%s225_s7] sm:$0xff]  ;;  %p272_p13 = scmp.lt.s32.totalorder %s923_s19, 1  ;;  %v352_v3 = vlaneseq }
  0x57   : > { %635 = vmatprep.subr.mxu0 %v873_v0  ;;  %637 = vmatprep.mubr.msk.f32.mxu0 %vm874_vm0, %v873_v0  ;;  %vm358_vm1 = vcmask 64512   ;;  %s271_s30 = scalar_lea.vmem [#allocation8], %s1053_s10  ;;  %s627_s9 = sshll.u32 %s923_s19, 7 }
  0x58   : > { %640 = vmatprep.subr.mxu1 %v873_v0  ;;  %642 = vmatprep.mubr.msk.f32.mxu1 %vm874_vm0, %v873_v0  ;;  %s273_s23 = scalar_select %p272_p13, %s923_s19, 1  ;;  %v353_v6 = vshrl.u32 %v352_v3, 7 }
  0x59   : > { %636 = vmatpush3.xpose.msra.mxu0 %v276_v1  ;;  %641 = vmatpush3.msra.mxu1 %v276_v1  ;;  %s1083_s5 = scalar_lea.hbm %s1157_s4, %s627_s9  ;;  %s477_s20 = sshll.u32 %s271_s30, 4  ;;  %s478_s20 = int_to_ptr.vmem [resolvable:$true] %s477_s20 }
  0x5a   : > { %s274_s26 = scalar_lea.vmem %s1155_s2, %s273_s23  ;;  %v354_v8 = vsub.s32 0, %v353_v6  ;;  %s451_s22 = scalar_lea.sflag [#allocation9], %s1050_s25 }
  0x5b   : > { %v348_v4 = vld [vmem:[%s274_s26] sm:$0x1]  ;;  %s767_s12 = scalar_lea.vmem %s478_s20, 128  ;;  %p1170_p7 = scmp.ne.s32.totalorder %s1162_s27, 0 }
  0x5c   : > { %638 = vmatmul.mubr.f32.vlgmr.msra.gmra.mrb[0].mxu0 %v275_v2  ;;  %v623_v5 = vadd.f32 -1.0, %v348_v4  ;;  %p768_p3 = scmp.ne.s32.totalorder %s478_s20, %s767_s12  ;;  %s875_s7 = smov [#allocation8]  }
  0x5d   : > { %s771_s11 = sshll.u32 %s875_s7, 4  ;;  %s772_s11 = int_to_ptr.vmem [resolvable:$false] %s771_s11 }
  0x5e   : > { %v350_v7 = vmul.f32 1e+30, %v623_v5  ;;  %p769_p5 = pnand %p768_p3, %p1170_p7  ;;  %s773_s13 = scalar_lea.vmem %s772_s11, 256 }
  0x5f   : > { %p774_p9 = scmp.lt.s32.totalorder %s478_s20, %s772_s11  ;;  %p775_p0 = scmp.lt.s32.totalorder %s773_s13, %s767_s12 }
  0x60   : > { %v355_v9 = vrot.slane %v350_v7, %v354_v8  ;;  %p770_p8 = pneg %p769_p5 }
  0x61   : > { %p776_p1 = por %p775_p0, %p774_p9 }
  0x63   : > { %p777_p11 = pnand %p776_p1, %p770_p8 }
 0x12f   : > { %v343_v10 = vpop.f32.mrb[0].mxu0 }
 0x130   : > { %v347_v11 = vmul.f32 0.088388346, %v343_v10  ;;  %v639_v12 = vpop.f32.mrb[1].mxu0 }
 0x132   : > { %v357_v13 = vadd.f32 %v355_v9, %v347_v11 }
 0x134   : > { %v359_v14 = vsel %vm358_vm1, %v357_v13, -inf }
 0x135   : > { %360 = vmax.xlane.f32.xlu0 %v359_v14 }
 0x1c2   : > { %v361_v15 = vpop.xlane.xlu0 %360 }
 0x1c3   : > { %v362_v16 = vsub.f32 %v357_v13, %v361_v15 }
 0x1c5   : > { %v363_v17 = vmul.f32 1.442695, %v362_v16 }
 0x1c7   : > { %703 = vpow2.f32 %v363_v17 }
 0x1d1   : > { %v704_v18 = vpop.eup %703 }
 0x1d2   : > { %v365_v19 = vsel %vm358_vm1, %v704_v18, 0.0 }
 0x1d3   : > { %366 = vadd.xlane.f32.xlu0 %v365_v19 }
 0x260   : > { %v367_v20 = vpop.xlane.xlu0 %366 }
 0x261   : > { %705 = vrcp.f32 %v367_v20 }
 0x26b   : > { %v706_v21 = vpop.eup %705 }
 0x26c   : > { %v369_v22 = vmul.f32 %v706_v21, %v704_v18 }
 0x26e   : > { %643 = vmatmul.mubr.msk.f32.vlgmr.msra.gmra.mrb[0].mxu1 %vm358_vm1, %v369_v22  ;;  %444 = vst.msk [vmem:[%s271_s30] sm:$0xff] %vm358_vm1, %v369_v22 }
 0x26f   : > { %780 = shalt.err (!%p777_p11)
}
 0x270   : > { %s781_s23 = scalar_lea.hbm %s1083_s5, 128  ;;  %s785_s26 = scalar_lea.hbm %s1157_s4, 256 }
 0x271   : > { %p782_p12 = scmp.ne.s32.totalorder %s1083_s5, %s781_s23  ;;  %p786_p10 = scmp.lt.u32.totalorder %s1083_s5, %s1157_s4 }
 0x272   : > { %p787_p6 = scmp.lt.u32.totalorder %s785_s26, %s781_s23  ;;  %p789_p3 = scmp.lt.u32.totalorder %s781_s23, %s1083_s5 }
 0x273   : > { %p783_p2 = pnand %p782_p12, %p1170_p7 }
 0x274   : > { %p788_p13 = por %p787_p6, %p786_p10 }
 0x275   : > { %p784_p4 = pneg %p783_p2 }
 0x276   : > { %p790_p5 = por %p789_p3, %p788_p13 }
 0x278   : > { %p791_p8 = pnand %p790_p5, %p784_p4 }
 0x27a   : > { %794 = shalt.err (!%p791_p8)
}
 0x27b   : > { %650 = dma.vmem_to_hbm [thread:$0]  (%p1170_p7), %s478_s20, 128, %s1083_s5, %s451_s22  }
 0x27c   : > { %s264_s29 = scalar_lea.vmem [#allocation7], %s1053_s10  ;;  %s1111_s13 = scalar_lea.hbm %s1156_s3, %s627_s9 }
 0x27d   : > { %s464_s12 = sshll.u32 %s264_s29, 4  ;;  %s446_s23 = scalar_lea.sflag [#allocation4], %s1050_s25  ;;  %s1104_s12 = int_to_ptr.vmem [resolvable:$true] %s464_s12 }
 0x27e   : > { %s795_s6 = scalar_lea.vmem %s1104_s12, 128  ;;  %s876_s10 = smov [#allocation7]  }
 0x27f   : > { %p796_p9 = scmp.ne.s32.totalorder %s1104_s12, %s795_s6  ;;  %s799_s5 = sshll.u32 %s876_s10, 4  ;;  %s800_s5 = int_to_ptr.vmem [resolvable:$false] %s799_s5 }
 0x280   : > { %s801_s19 = scalar_lea.vmem %s800_s5, 256  ;;  %p802_p11 = scmp.lt.s32.totalorder %s1104_s12, %s800_s5 }
 0x281   : > { %p797_p0 = pnand %p796_p9, %p1170_p7  ;;  %p803_p12 = scmp.lt.s32.totalorder %s801_s19, %s795_s6 }
 0x283   : > { %p798_p1 = pneg %p797_p0  ;;  %p804_p2 = por %p803_p12, %p802_p11 }
 0x285   : > { %p805_p4 = pnand %p804_p2, %p798_p1 }
 0x341   : > { %v439_v23 = vpop.f32.mrb[0].mxu1 }
 0x342   : > { %443 = vst [vmem:[%s264_s29] sm:$0xff] %v439_v23  ;;  %v644_v24 = vpop.f32.mrb[1].mxu1 }
 0x343   : > { %808 = shalt.err (!%p805_p4)
}
 0x344   : > { %s809_s25 = scalar_lea.hbm %s1111_s13, 128  ;;  %s813_s22 = scalar_lea.hbm %s1156_s3, 256 }
 0x345   : > { %p810_p10 = scmp.ne.s32.totalorder %s1111_s13, %s809_s25  ;;  %p814_p3 = scmp.lt.u32.totalorder %s1111_s13, %s1156_s3 }
 0x346   : > { %p815_p5 = scmp.lt.u32.totalorder %s813_s22, %s809_s25  ;;  %p817_p9 = scmp.lt.u32.totalorder %s809_s25, %s1111_s13 }
 0x347   : > { %p811_p6 = pnand %p810_p10, %p1170_p7 }
 0x348   : > { %p816_p8 = por %p815_p5, %p814_p3 }
 0x349   : > { %p812_p13 = pneg %p811_p6 }
 0x34a   : > { %p818_p0 = por %p817_p9, %p816_p8 }
 0x34c   : > { %p819_p1 = pnand %p818_p0, %p812_p13 }
 0x34e   : > { %822 = shalt.err (!%p819_p1)
}
 0x34f   : > { %649 = dma.vmem_to_hbm [thread:$0]  (%p1170_p7), %s1104_s12, 128, %s1111_s13, %s446_s23  }
 0x350 PF: > { %s489_s30 = sand.u32 1, %s857_s15   ;;  %p1171_p11 = scmp.ne.s32.totalorder %s1163_s28, 0 }
 0x351   : > { %p1172_p12 = scmp.ge.s32.totalorder %s869_s18, 2  ;;  %s490_s14 = scalar_lea.sflag [#allocation4], %s489_s30 }
 0x353   : > { %p661_p2 = pnand %p1172_p12, %p1171_p11 }
 0x355   : > { %848 = dma.done.wait (!%p661_p2), %s490_s14, 128  }
 0x356   : > { %850 = vsyncadd (!%p661_p2), %s490_s14, 4294967168  ;;  %s499_s29 = scalar_lea.sflag [#allocation9], %s489_s30 }
 0x357   : > { %852 = dma.done.wait (!%p661_p2), %s499_s29, 128  }
 0x358   : > { %854 = vsyncadd (!%p661_p2), %s499_s29, 4294967168  ;;  %p24_p7 = scmp.ge.s32.totalorder %s927_s21, 4   ;;  %s1173_s15 = smov %s861_s16 }
 0x359   : > { %s1174_s16 = smov %s865_s17  ;;  %s1175_s17 = smov %s939_s24 }
 0x35a   : > { %s1176_s18 = smov %s927_s21  ;;  %26 = sbr.rel (!%p24_p7) target bundleno = 9 (0x9), region = 110 }
 0x361   :  { %504 = vsyncpa [#allocation3], 1 }
 0x362   :  { %506 = vsyncpa [#allocation3 + $0x1], 1 }
 0x363   :  { %507 = vsyncpa [#allocation6], 1 }
 0x364   :  { %509 = vsyncpa [#allocation6 + $0x1], 1 }
 0x365   :  { %510 = vsyncpa [#allocation4], 1 }
 0x366   :  { %512 = vsyncpa [#allocation4 + $0x1], 1 }
 0x367   :  { %513 = vsyncpa [#allocation9], 1 }
 0x368   :  { %515 = vsyncpa [#allocation9 + $0x1], 1 }

</bundles_post_ra>
